<compile_context>
chip_gen: v7x
topology: tpu7x:2x2x1
jax: 0.10.0
libtpu: 0.0.40
codegen_flags: <defaults>
</compile_context>

<pallas_src>
import functools

import jax
import jax.numpy as jnp
from jax.experimental import pallas as pl
from jax.experimental.pallas import tpu as pltpu


def _conv_bn_relu_kernel(x_ref, w_ref, bias_ref, o_ref, *, th, K, WCp,
                         apply_relu):
    """One output row-tile of fused Conv2d (+BN) (+ReLU).

    x_ref:    (1, H+2*pad, WCp)  bf16  merged (w,cin) input, full image
    w_ref:    (K*WCp, W*Cout)    bf16  block-banded weight, BN scale folded in
    bias_ref: (1, W*Cout)        f32   folded conv+BN bias, tiled per w
    o_ref:    (1, th, W*Cout)    bf16  lane-dense output row tile
    """
    h0 = pl.multiple_of(pl.program_id(1) * th, th)
    # Load the halo'd row slab once (aligned dynamic start).
    slab = x_ref[0, pl.ds(h0, th + K - 1), :]                  # (th+K-1, WCp)

    # K accumulating MXU dots against static, 128-aligned row slices of the
    # banded weight (no im2col concat -> no extra VMEM copy on the vst slot).
    acc = jnp.dot(slab[0:th, :], w_ref[0:WCp, :],
                  preferred_element_type=jnp.float32)
    for kh in range(1, K):
        acc = acc + jnp.dot(slab[kh:kh + th, :],
                            w_ref[kh * WCp:(kh + 1) * WCp, :],
                            preferred_element_type=jnp.float32)

    out = acc + bias_ref[...]                                  # (th, W*Cout)
    if apply_relu:
        out = jnp.maximum(out, 0.0)
    o_ref[0] = out.astype(o_ref.dtype)


def _pick_row_tile(H, cap=128):
    """Largest multiple-of-8 divisor of H that is <= cap (MXU M rows)."""
    best = None
    t = 8
    while t <= min(H, cap):
        if H % t == 0:
            best = t
        t += 8
    return best if best is not None else H


def conv_relu_pallas(x_nchw, weight, conv_bias, bn_gamma, bn_beta, bn_mean,
                     bn_var, *, stride=1, relu=True, bn=True, eps=1e-5,
                     merged_output=False):
    """ConvReLU forward. x_nchw: (N, Cin, H, W); weight: (Cout, Cin, K, K)."""
    assert stride == 1, "only stride=1 is implemented"
    N, Cin, H, W = x_nchw.shape
    Cout, _, K, Kw = weight.shape
    assert K == Kw and K % 2 == 1, "odd square kernels only ('same' padding)"
    pad = (K - 1) // 2
    Hp = H + 2 * pad
    WC = W * Cin
    WCp = ((WC + 127) // 128) * 128          # lane-align the merged input
    WCout = W * Cout

    # ---- glue (plain JAX, fused by XLA): layout + parameter folding ----
    # merged lane-dense input: (N, Hp, WCp) in bf16, zero-padded in H and lanes
    x_m = jnp.transpose(x_nchw, (0, 2, 3, 1)).reshape(N, H, WC)
    x_m = jnp.pad(x_m, ((0, 0), (pad, pad), (0, WCp - WC))).astype(jnp.bfloat16)

    if bn:
        scale = bn_gamma / jnp.sqrt(bn_var + eps)             # (Cout,)
        bias = (conv_bias - bn_mean) * scale + bn_beta
    else:
        scale = jnp.ones((Cout,), jnp.float32)
        bias = conv_bias.astype(jnp.float32)

    # Block-banded weight: rows indexed by (kh, w_in, ci) (w_in lane-padded to
    # WCp), cols by (w_out, co).  band[kh, w_in, ci, w_out, co] =
    #   w[kh, kw, ci, co] * scale[co]  with kw = w_in - w_out + pad, if valid.
    # The band also realizes the zero padding in W (out-of-range taps absent).
    w_t = jnp.transpose(weight, (2, 3, 1, 0)).astype(jnp.float32)  # (kh,kw,ci,co)
    w_t = w_t * scale[None, None, None, :]                         # fold BN scale
    w_in = jnp.arange(W)[:, None]
    w_out = jnp.arange(W)[None, :]
    kw = w_in - w_out + pad                                        # (W, W)
    valid = (kw >= 0) & (kw < K)
    band = w_t[:, jnp.clip(kw, 0, K - 1)]                          # (K,W,W,Cin,Cout)
    band = jnp.where(valid[None, :, :, None, None], band, 0.0)
    band = jnp.transpose(band, (0, 1, 3, 2, 4))                    # (kh,w_in,ci,w_out,co)
    band = band.reshape(K, WC, WCout)
    band = jnp.pad(band, ((0, 0), (0, WCp - WC), (0, 0)))
    big_w = band.reshape(K * WCp, WCout).astype(jnp.bfloat16)

    bias_t = jnp.tile(bias.astype(jnp.float32), W).reshape(1, WCout)

    th = _pick_row_tile(H, cap=128)          # output row-tile height (MXU M)
    kernel = functools.partial(_conv_bn_relu_kernel, th=th, K=K, WCp=WCp,
                               apply_relu=relu)

    # Explicit VMEM budget derived from the actual block footprint (so larger
    # th / image sizes compile on v6e/v7x scoped defaults).
    vmem_need = (2 * Hp * WCp * 2            # input block (double-buffered)
                 + 2 * K * WCp * WCout * 2   # banded weight
                 + 2 * WCout * 4             # bias
                 + 2 * th * WCout * 2        # output block (bf16)
                 + th * WCout * 4            # fp32 accumulator
                 + (th + K) * WCp * 4)       # slab / tap relayouts headroom
    vmem_limit = int(min(max(3 * vmem_need, 32 * 1024 * 1024),
                         96 * 1024 * 1024))

    out_m = pl.pallas_call(
        kernel,
        out_shape=jax.ShapeDtypeStruct((N, H, WCout), jnp.bfloat16),
        grid_spec=pltpu.PrefetchScalarGridSpec(
            num_scalar_prefetch=0,
            grid=(N, H // th),
            in_specs=[
                # full padded image per n; block index constant across h-tiles
                pl.BlockSpec((1, Hp, WCp), lambda n, h: (n, 0, 0)),
                pl.BlockSpec((K * WCp, WCout), lambda n, h: (0, 0)),
                pl.BlockSpec((1, WCout), lambda n, h: (0, 0)),
            ],
            out_specs=pl.BlockSpec((1, th, WCout), lambda n, h: (n, h, 0)),
        ),
        compiler_params=pltpu.CompilerParams(
            dimension_semantics=("parallel", "arbitrary"),
            vmem_limit_bytes=vmem_limit),
    )(x_m, big_w, bias_t)

    if merged_output:
        # Lane-dense (N, H, W*Cout) bf16 layout for the next ConvReLU layer.
        return out_m
    # Single-layer / network-boundary path: unmerge back to NCHW once.
    out = out_m.reshape(N, H, W, Cout).transpose(0, 3, 1, 2)
    return out.astype(x_nchw.dtype)


def _reference(x_nchw, weight, conv_bias, bn_gamma, bn_beta, bn_mean, bn_var,
               *, relu=True, bn=True, eps=1e-5):
    pad = (weight.shape[-1] - 1) // 2
    y = jax.lax.conv_general_dilated(
        x_nchw, weight, window_strides=(1, 1),
        padding=((pad, pad), (pad, pad)),
        dimension_numbers=("NCHW", "OIHW", "NCHW"))
    y = y + conv_bias[None, :, None, None]
    if bn:
        y = (y - bn_mean[None, :, None, None]) / jnp.sqrt(
            bn_var[None, :, None, None] + eps)
        y = y * bn_gamma[None, :, None, None] + bn_beta[None, :, None, None]
    if relu:
        y = jnp.maximum(y, 0.0)
    return y


if __name__ == "__main__":
    key = jax.random.PRNGKey(0)
    k_x, k_w, k_b, k_g, k_be, k_m, k_v = jax.random.split(key, 7)

    # ConvReLU(in_ch=4, out_ch=8, kernel_sz=3) -- small synthetic shapes
    N, Cin, Cout, H, W, K = 2, 4, 8, 16, 16, 3

    x = jax.random.normal(k_x, (N, Cin, H, W), dtype=jnp.float32)
    weight = jax.random.normal(k_w, (Cout, Cin, K, K), dtype=jnp.float32) * 0.1
    conv_bias = jax.random.normal(k_b, (Cout,), dtype=jnp.float32) * 0.1

    # BatchNorm2d inference-mode (running-stats) parameters; made non-trivial
    # to actually exercise the scale/bias folding path.
    bn_gamma = 1.0 + 0.1 * jax.random.normal(k_g, (Cout,), dtype=jnp.float32)
    bn_beta = 0.1 * jax.random.normal(k_be, (Cout,), dtype=jnp.float32)
    bn_mean = 0.1 * jax.random.normal(k_m, (Cout,), dtype=jnp.float32)
    bn_var = 1.0 + 0.5 * jax.random.uniform(k_v, (Cout,), dtype=jnp.float32)

    out = conv_relu_pallas(x, weight, conv_bias, bn_gamma, bn_beta,
                           bn_mean, bn_var, relu=True, bn=True)
    out = jax.block_until_ready(out)

    ref = _reference(x, weight, conv_bias, bn_gamma, bn_beta, bn_mean, bn_var,
                     relu=True, bn=True)
    assert out.shape == (N, Cout, H, W)
    # bf16 operands + bf16 output storage, fp32 accumulation: loosen tolerance.
    max_err = float(jnp.max(jnp.abs(out - ref)))
    assert jnp.allclose(out, ref, atol=4e-2, rtol=4e-2), (
        "mismatch vs reference, max abs err = %g" % max_err)

    print("KERNEL_OK")
</pallas_src>

<mosaic_0001>
module attributes {stable_mosaic.version = 11 : i64} {
  func.func @_conv_bn_relu_kernel(%arg0: i32, %arg1: i32, %arg2: memref<1x18x128xbf16, #tpu.memory_space<vmem>>, %arg3: memref<384x128xbf16, #tpu.memory_space<vmem>>, %arg4: memref<1x128xf32, #tpu.memory_space<vmem>>, %arg5: memref<1x16x128xbf16, #tpu.memory_space<vmem>>) attributes {dimension_semantics = [#tpu.dimension_semantics<parallel>, #tpu.dimension_semantics<arbitrary>], iteration_bounds = array<i64: 2, 1>, scalar_prefetch = 0 : i64, scratch_operands = 0 : i64, tpu.core_type = #tpu.core_type<tc>, window_params = [{transform_indices = @transform_0, window_bounds = array<i64: 1, 18, 128>}, {pipeline_mode = #tpu.pipeline_mode<synchronous>, transform_indices = @transform_1, window_bounds = array<i64: 384, 128>}, {pipeline_mode = #tpu.pipeline_mode<synchronous>, transform_indices = @transform_2, window_bounds = array<i64: 1, 128>}, {transform_indices = @transform_3, window_bounds = array<i64: 1, 16, 128>}]} {
    %c16_i32 = arith.constant 16 : i32
    %0 = arith.muli %arg1, %c16_i32 : i32
    %1 = tpu.assume_multiple %0, 16 : i32
    %c0 = arith.constant 0 : index
    %2 = arith.index_cast %1 : i32 to index
    %c0_0 = arith.constant 0 : index
    %3 = vector.load %arg2[%c0, %2, %c0_0] : memref<1x18x128xbf16, #tpu.memory_space<vmem>>, vector<1x18x128xbf16>
    %4 = vector.shape_cast %3 : vector<1x18x128xbf16> to vector<18x128xbf16>
    %5 = vector.extract_strided_slice %4 {offsets = [0, 0], sizes = [16, 128], strides = [1, 1]} : vector<18x128xbf16> to vector<16x128xbf16>
    %c0_1 = arith.constant 0 : index
    %c0_2 = arith.constant 0 : index
    %6 = vector.load %arg3[%c0_1, %c0_2] : memref<384x128xbf16, #tpu.memory_space<vmem>>, vector<128x128xbf16>
    %cst = arith.constant dense<0.000000e+00> : vector<16x128xf32>
    %7 = tpu.matmul %5, %6, %cst {dimension_numbers = #tpu.dot_dimension_numbers<[1], [0], [0], [1], [0, 0, 1, 1], [], []>} : vector<16x128xbf16>, vector<128x128xbf16>, vector<16x128xf32> -> vector<16x128xf32>
    %8 = vector.extract_strided_slice %4 {offsets = [1, 0], sizes = [16, 128], strides = [1, 1]} : vector<18x128xbf16> to vector<16x128xbf16>
    %c128 = arith.constant 128 : index
    %c0_3 = arith.constant 0 : index
    %9 = vector.load %arg3[%c128, %c0_3] : memref<384x128xbf16, #tpu.memory_space<vmem>>, vector<128x128xbf16>
    %cst_4 = arith.constant dense<0.000000e+00> : vector<16x128xf32>
    %10 = tpu.matmul %8, %9, %cst_4 {dimension_numbers = #tpu.dot_dimension_numbers<[1], [0], [0], [1], [0, 0, 1, 1], [], []>} : vector<16x128xbf16>, vector<128x128xbf16>, vector<16x128xf32> -> vector<16x128xf32>
    %11 = arith.addf %7, %10 : vector<16x128xf32>
    %12 = vector.extract_strided_slice %4 {offsets = [2, 0], sizes = [16, 128], strides = [1, 1]} : vector<18x128xbf16> to vector<16x128xbf16>
    %c256 = arith.constant 256 : index
    %c0_5 = arith.constant 0 : index
    %13 = vector.load %arg3[%c256, %c0_5] : memref<384x128xbf16, #tpu.memory_space<vmem>>, vector<128x128xbf16>
    %cst_6 = arith.constant dense<0.000000e+00> : vector<16x128xf32>
    %14 = tpu.matmul %12, %13, %cst_6 {dimension_numbers = #tpu.dot_dimension_numbers<[1], [0], [0], [1], [0, 0, 1, 1], [], []>} : vector<16x128xbf16>, vector<128x128xbf16>, vector<16x128xf32> -> vector<16x128xf32>
    %15 = arith.addf %11, %14 : vector<16x128xf32>
    %c0_7 = arith.constant 0 : index
    %c0_8 = arith.constant 0 : index
    %16 = vector.load %arg4[%c0_7, %c0_8] : memref<1x128xf32, #tpu.memory_space<vmem>>, vector<1x128xf32>
    %17 = vector.broadcast %16 : vector<1x128xf32> to vector<16x128xf32>
    %18 = arith.addf %15, %17 : vector<16x128xf32>
    %cst_9 = arith.constant 0.000000e+00 : f32
    %19 = vector.broadcast %cst_9 : f32 to vector<16x128xf32>
    %20 = arith.maximumf %18, %19 : vector<16x128xf32>
    %21 = arith.truncf %20 : vector<16x128xf32> to vector<16x128xbf16>
    %c0_10 = arith.constant 0 : index
    %c0_11 = arith.constant 0 : index
    %c0_12 = arith.constant 0 : index
    %22 = vector.load %arg5[%c0_10, %c0_11, %c0_12] : memref<1x16x128xbf16, #tpu.memory_space<vmem>>, vector<1x16x128xbf16>
    %23 = vector.shape_cast %22 : vector<1x16x128xbf16> to vector<16x128xbf16>
    %24 = vector.shape_cast %21 : vector<16x128xbf16> to vector<1x16x128xbf16>
    tpu.vector_store %arg5[%c0_10, %c0_11, %c0_12], %24 {strides = array<i32>} : memref<1x16x128xbf16, #tpu.memory_space<vmem>>, vector<1x16x128xbf16>,
    return
  }
  func.func @transform_0(%arg0: i32, %arg1: i32) -> (i32, i32, i32) {
    %c0_i32 = arith.constant 0 : i32
    %c0_i32_0 = arith.constant 0 : i32
    %c0_i32_1 = arith.constant 0 : i32
    return %arg0, %c0_i32, %c0_i32_0 : i32, i32, i32
  }
  func.func @transform_1(%arg0: i32, %arg1: i32) -> (i32, i32) {
    %c0_i32 = arith.constant 0 : i32
    %c0_i32_0 = arith.constant 0 : i32
    %c0_i32_1 = arith.constant 0 : i32
    return %c0_i32, %c0_i32_0 : i32, i32
  }
  func.func @transform_2(%arg0: i32, %arg1: i32) -> (i32, i32) {
    %c0_i32 = arith.constant 0 : i32
    %c0_i32_0 = arith.constant 0 : i32
    %c0_i32_1 = arith.constant 0 : i32
    return %c0_i32, %c0_i32_0 : i32, i32
  }
  func.func @transform_3(%arg0: i32, %arg1: i32) -> (i32, i32, i32) {
    %c0_i32 = arith.constant 0 : i32
    %c0_i32_0 = arith.constant 0 : i32
    return %arg0, %arg1, %c0_i32 : i32, i32, i32
  }
}

</mosaic_0001>

<bundles_post_ra>
// kernel: tpu_custom_call.1
= control target key start
LH: loop header
LB: loop body
LE: loop exit
PB: predicated region body
PF: predicated region fallthrough
CT: control target
= control target key end

     0   :  { %8 = vsyncpa [#allocation3], 0  ;;  %s1240_s0 = inlined_call_operand.vmem [shape: bf16[2,18,128], index: 0, kind: input, shape index: {}]   ;;  %s1241_s1 = inlined_call_operand.hbm [shape: bf16[384,128], index: 1, kind: input, shape index: {}]   ;;  %s1242_s2 = inlined_call_operand.vmem [shape: f32[1,128], index: 2, kind: input, shape index: {}]   ;;  %s1243_s3 = inlined_call_operand.hbm [shape: bf16[2,16,128], index: 3, kind: output, shape index: {}]  }
   0x1   :  { %9 = vsyncpa [#allocation4], 0 }
   0x2   :  { %11 = vsyncpa [#allocation4 + $0x1], 0  ;;  %s1054_s12 = smov 0   ;;  %s1056_s13 = smov 0  }
   0x3   :  { %s1058_s14 = smov 0   ;;  %s1060_s15 = smov 0  }
   0x4   :  { %s1062_s16 = smov 0   ;;  %s1064_s17 = smov 0  }
   0x5 LB: > { %s677_s18 = sadd.s32 4294967295, %s1024_s17   ;;  %s678_s19 = sadd.s32 4294967294, %s1024_s17   ;;  %s1024_s17 = sphi %s1064_s17, %s17_s17   ;;  %s1020_s16 = sphi %s1062_s16, %s1261_s16   ;;  %s1016_s15 = sphi %s1060_s15, %s1260_s15   ;;  %s1012_s14 = sphi %s1058_s14, %s1259_s14   ;;  %s1008_s13 = sphi %s1056_s13, %s1258_s13   ;;  %s1004_s12 = sphi %s1054_s12, %s1257_s12  }
   0x6   : > { %s29_s20 = sadd.s32 1, %s1020_s16  ;;  %s106_s21 = sadd.s32 1, %s1012_s14 }
   0x7   : > { %p31_p0 = scmp.ge.s32.totalorder %s29_s20, 2  ;;  %p116_p1 = scmp.ne.s32.totalorder %s1012_s14, %s1008_s13 }
   0x8   : > { %p117_p2 = scmp.eq.s32.totalorder %s677_s18, 1  ;;  %p122_p3 = scmp.ne.s32.totalorder %s1008_s13, %s1004_s12 }
   0x9   : > { %s1263_s20 = smov (%p31_p0, %s29_s20), 0  ;;  %p123_p5 = scmp.eq.s32.totalorder %s678_s19, 1 }
   0xa   : > { %p1094_p4 = por %p117_p2, %p116_p1  ;;  %s101_s23 = ssub.s32 %s1020_s16, %s1263_s20 }
   0xb   : > { %p679_p6 = scmp.ge.s32.totalorder %s1024_s17, 1  ;;  %p104_p7 = scmp.eq.s32.totalorder %s101_s23, 0 }
   0xc   : > { %s1248_s22 = scalar_select %p1094_p4, 1, 0 }
   0xd   : > { %p1101_p8 = por %p123_p5, %p122_p3  ;;  %p130_p9 = scmp.lt.s32.totalorder %s1024_s17, 3 }
   0xe   : > { %s1107_s25 = scalar_select %p104_p7, %s1012_s14, %s106_s21  }
   0xf   : > { %s1249_s24 = scalar_select %p1101_p8, 1, 0 }
  0x10   : > { %p1109_p10 = pnand %p679_p6, %p130_p9  ;;  %p1113_p11 = scmp.eq.s32.totalorder %s677_s18, 0 }
  0x11   : > { %s1026_s28 = smov [#allocation2]   ;;  %s914_s6 = scalar_lea.hbm %s1241_s1, 3072 }
  0x12   : > { %s1250_s26 = scalar_select %p1109_p10, 1, 0 }
  0x13   : > { %s1251_s27 = scalar_select %p1113_p11, 1, 0 }
  0x14   : > { %p822_p12 = pneg %p1109_p10  ;;  %s142_s29 = sshll.u32 %s1026_s28, 4  ;;  %s143_s29 = int_to_ptr.vmem [resolvable:$true] %s142_s29 }
  0x15   : > { %p915_p0 = scmp.ne.s32.totalorder %s1241_s1, %s914_s6  ;;  %p921_p5 = scmp.lt.u32.totalorder %s914_s6, %s1241_s1 }
  0x16   : > { %p1121_p13 = pnand %p1113_p11, %p822_p12 }
  0x18   : > { %p916_p1 = pneg %p1121_p13 }
  0x1a   : > { %p917_p2 = pnand %p916_p1, %p915_p0 }
  0x1c   : > { %p918_p3 = pneg %p917_p2 }
  0x1e   : > { %p923_p6 = pnand %p921_p5, %p918_p3 }
  0x20   : > { %926 = shalt.err (!%p923_p6)
}
  0x21   : > { %s927_s11 = scalar_lea.vmem %s143_s29, 3072  ;;  %p935_p8 = scmp.lt.s32.totalorder %s143_s29, %s143_s29 }
  0x22   : > { %p928_p7 = scmp.ne.s32.totalorder %s143_s29, %s927_s11  ;;  %p936_p4 = scmp.lt.s32.totalorder %s927_s11, %s927_s11 }
  0x24   : > { %p930_p9 = pnand %p928_p7, %p916_p1  ;;  %p937_p11 = por %p936_p4, %p935_p8 }
  0x26   : > { %p931_p12 = pneg %p930_p9 }
  0x28   : > { %p938_p10 = pnand %p937_p11, %p931_p12 }
  0x2a   : > { %941 = shalt.err (!%p938_p10)
}
  0x2b   : > { %s1027_s18 = smov 64   ;;  %s1028_s19 = smov 4  }
  0x2c   : > { %825 = dma.hbm_to_vmem [thread:$0]  (!%p1121_p13), %s1241_s1, 3072, %s143_s29, [#allocation3], %s1027_s18, %s1027_s18, %s1028_s19  }
  0x2d   : > { %p1253_p0 = scmp.ne.s32.totalorder %s1250_s26, 0 }
  0x2e   : > { %p1254_p2 = scmp.ne.s32.totalorder (!%p1253_p0), %s1251_s27, 0 }
  0x2f   : > { %169 = sbr.rel (%p1253_p0) target bundleno = 358 (0x166), region = 32 }
  0x36   : > { %995 = dma.done.wait (%p1254_p2), [#allocation3], 3072  }
  0x37   : > { %997 = vsyncadd (%p1254_p2), [#allocation3], 4294964224  ;;  %v1029_v0 = vmov 0.0   ;;  %vm1030_vm0 = vmmov 0   ;;  %v888_v1 = vld [vmem:[#allocation2 + $0x40] sm:$0xff]   ;;  %v890_v3 = vld [vmem:[#allocation2 + $0x48] sm:$0xff]  }
  0x38   : > { %755 = vmatprep.subr.bf16.mxu0 %v1029_v0  ;;  %775 = vmatprep.subr.bf16.mxu1 %v1029_v0  ;;  %v889_v2 = vld [vmem:[#allocation2] sm:$0xff]   ;;  %p193_p4 = scmp.lt.s32.totalorder %s1016_s15, 1  ;;  %v891_v4 = vld [vmem:[#allocation2 + $0x8] sm:$0xff]   ;;  %v892_v5 = vld [vmem:[#allocation2 + $0x50] sm:$0xff]   ;;  %vm248_vm1 = vsmask.f32 7424 }
  0x39   : > { %771 = vmatprep.mubr.msk.bf16.mxu0 %vm1030_vm0, %v1029_v0  ;;  %791 = vmatprep.mubr.msk.bf16.mxu1 %vm1030_vm0, %v1029_v0  ;;  %v893_v6 = vld [vmem:[#allocation2 + $0x10] sm:$0xff]   ;;  %v894_v7 = vld [vmem:[#allocation2 + $0x58] sm:$0xff]   ;;  %v896_v9 = vld [vmem:[#allocation2 + $0x60] sm:$0xff]   ;;  %vm457_vm2 = vcmask 1046528   ;;  %s190_s4 = sand.u32 1, %s1008_s13   ;;  %s722_s8 = sshll.u32 %s1016_s15, 7 }
  0x3a   : > { %756 = vmatpush3.bf16.msra.mxu0 %v888_v1  ;;  %776 = vmatpush3.bf16.msra.mxu1 %v889_v2  ;;  %s194_s26 = scalar_select %p193_p4, %s1016_s15, 1  ;;  %v895_v8 = vld [vmem:[#allocation2 + $0x18] sm:$0xff]   ;;  %v897_v10 = vld [vmem:[#allocation2 + $0x20] sm:$0xff]   ;;  %v898_v13 = vld [vmem:[#allocation2 + $0x68] sm:$0xff]  }
  0x3b   : > { %757 = vmatprep.subr.bf16.mxu0 %v1029_v0  ;;  %777 = vmatprep.subr.bf16.mxu1 %v1029_v0  ;;  %v899_v14 = vld [vmem:[#allocation2 + $0x28] sm:$0xff]   ;;  %v900_v16 = vld [vmem:[#allocation2 + $0x70] sm:$0xff]   ;;  %v902_v21 = vld [vmem:[#allocation2 + $0x78] sm:$0xff]   ;;  %s684_s5 = sshll.u32 %s190_s4, 3  ;;  %s1190_s19 = scalar_lea.hbm %s1243_s3, %s722_s8 }
  0x3c   : > { %s815_s27 = smul.u32 12, %s194_s26  ;;  %v901_v20 = vld [vmem:[#allocation2 + $0x30] sm:$0xff]   ;;  %v903_v24 = vld [vmem:[#allocation2 + $0x38] sm:$0xff]   ;;  %v906_v26 = vld [vmem:[#allocation2 + $0x80] sm:$0xff]   ;;  %s192_s9 = scalar_lea.vmem [#allocation5], %s684_s5 }
  0x3d   : > { %v907_v27 = vld [vmem:[#allocation2 + $0x88] sm:$0xff]   ;;  %v908_v28 = vld [vmem:[#allocation2 + $0x90] sm:$0xff]   ;;  %v909_v29 = vld [vmem:[#allocation2 + $0x98] sm:$0xff]   ;;  %s590_s10 = sshll.u32 %s192_s9, 4  ;;  %s1194_s21 = scalar_lea.sflag [#allocation4], %s190_s4  ;;  %s1192_s10 = int_to_ptr.vmem [resolvable:$true] %s590_s10 }
  0x3e   : > { %758 = vmatpush3.bf16.msra.mxu0 %v890_v3  ;;  %778 = vmatpush3.bf16.msra.mxu1 %v891_v4  ;;  %s197_s30 = scalar_lea.vmem %s1240_s0, %s815_s27  ;;  %v910_v30 = vld [vmem:[#allocation2 + $0xa0] sm:$0xff]   ;;  %v911_v31 = vld [vmem:[#allocation2 + $0xa8] sm:$0xff]   ;;  %v912_v32 = vld [vmem:[#allocation2 + $0xb0] sm:$0xff]   ;;  %s942_s23 = scalar_lea.vmem %s1192_s10, 128 }
  0x3f   : > { %759 = vmatprep.subr.bf16.mxu0 %v1029_v0  ;;  %779 = vmatprep.subr.bf16.mxu1 %v1029_v0  ;;  %v904_v11 = vld [vmem:[%s197_s30] sm:$0xff]   ;;  %v905_v12 = vld [vmem:[%s197_s30 + $0x8] ss:$0 sps:$4 sm:$0x11]   ;;  %v913_v33 = vld [vmem:[#allocation2 + $0xb8] sm:$0xff]   ;;  %p943_p8 = scmp.ne.s32.totalorder %s1192_s10, %s942_s23  ;;  %p1255_p10 = scmp.ne.s32.totalorder %s1248_s22, 0 }
  0x40   : > { %v252_v15 = vshll.u32 %v904_v11, 16  ;;  %v250_v17 = vshrl.u32 %v904_v11, 16  ;;  %v257_v19 = vshll.u32 %v905_v12, 16  ;;  %v458_v34 = vrot.slane %v904_v11, 1  ;;  %v712_v48 = vld [vmem:[%s1242_s2] ss:$0 sm:$0xff] }
  0x41   : > { %v459_v35 = vrot.slane %v905_v12, 1  ;;  %p944_p11 = pnand %p943_p8, %p1255_p10  ;;  %s1031_s15 = smov [#allocation5]  }
  0x42   : > { %760 = vmatpush3.bf16.msra.mxu0 %v892_v5  ;;  %780 = vmatpush3.bf16.msra.mxu1 %v893_v6  ;;  %v254_v18 = vrot.slane %v252_v15, 1  ;;  %v259_v23 = vrot.slane %v257_v19, 1  ;;  %s946_s26 = sshll.u32 %s1031_s15, 4  ;;  %s947_s26 = int_to_ptr.vmem [resolvable:$false] %s946_s26 }
  0x43   : > { %761 = vmatprep.subr.bf16.mxu0 %v1029_v0  ;;  %781 = vmatprep.subr.bf16.mxu1 %v1029_v0  ;;  %v460_v36 = vsel %vm457_vm2, %v458_v34, %v459_v35  ;;  %p945_p13 = pneg %p944_p11  ;;  %s948_s27 = scalar_lea.vmem %s947_s26, 256 }
  0x44   : > { %v255_v22 = vor.u32 %v254_v18, %v250_v17  ;;  %p949_p1 = scmp.lt.s32.totalorder %s1192_s10, %s947_s26  ;;  %p950_p3 = scmp.lt.s32.totalorder %s948_s27, %s942_s23 }
  0x46   : > { %762 = vmatpush3.bf16.msra.mxu0 %v894_v7  ;;  %782 = vmatpush3.bf16.msra.mxu1 %v895_v8  ;;  %v260_v25 = vsel %vm248_vm1, %v255_v22, %v259_v23  ;;  %p951_p5 = por %p950_p3, %p949_p1 }
  0x47   : > { %763 = vmatprep.subr.bf16.mxu0 %v1029_v0  ;;  %783 = vmatprep.subr.bf16.mxu1 %v1029_v0 }
  0x48   : > { %p952_p6 = pnand %p951_p5, %p945_p13 }
  0x4a   : > { %764 = vmatpush3.bf16.msra.mxu0 %v896_v9  ;;  %784 = vmatpush3.bf16.msra.mxu1 %v897_v10 }
  0x4b   : > { %765 = vmatprep.subr.bf16.mxu0 %v1029_v0  ;;  %785 = vmatprep.subr.bf16.mxu1 %v1029_v0 }
  0x4e   : > { %766 = vmatpush3.bf16.msra.mxu0 %v898_v13  ;;  %786 = vmatpush3.bf16.msra.mxu1 %v899_v14 }
  0x4f   : > { %767 = vmatprep.subr.bf16.mxu0 %v1029_v0  ;;  %787 = vmatprep.subr.bf16.mxu1 %v1029_v0 }
  0x52   : > { %768 = vmatpush3.bf16.msra.mxu0 %v900_v16  ;;  %788 = vmatpush3.bf16.msra.mxu1 %v901_v20 }
  0x53   : > { %769 = vmatprep.subr.bf16.mxu0 %v1029_v0  ;;  %789 = vmatprep.subr.bf16.mxu1 %v1029_v0 }
  0x56   : > { %770 = vmatpush3.bf16.msra.mxu0 %v902_v21  ;;  %790 = vmatpush3.bf16.msra.mxu1 %v903_v24 }
  0x57   : > { %795 = vmatprep.subr.bf16.mxu0 %v1029_v0 }
  0x59   : > { %772 = vmatmul.mubr.bf16.vlgmr.msra.gmra.mrb[0].mxu0 %v260_v25  ;;  %792 = vmatmul.mubr.bf16.vlgmr.msra.gmra.mrb[0].mxu1 %v904_v11 }
  0x5a   : > { %796 = vmatpush3.bf16.msra.mxu0 %v906_v26  ;;  %811 = vmatprep.mubr.msk.bf16.mxu0 %vm1030_vm0, %v1029_v0 }
  0x5b   : > { %797 = vmatprep.subr.bf16.mxu0 %v1029_v0 }
  0x5e   : > { %798 = vmatpush3.bf16.msra.mxu0 %v907_v27 }
  0x5f   : > { %799 = vmatprep.subr.bf16.mxu0 %v1029_v0 }
  0x62   : > { %800 = vmatpush3.bf16.msra.mxu0 %v908_v28 }
  0x63   : > { %801 = vmatprep.subr.bf16.mxu0 %v1029_v0 }
  0x66   : > { %802 = vmatpush3.bf16.msra.mxu0 %v909_v29 }
  0x67   : > { %803 = vmatprep.subr.bf16.mxu0 %v1029_v0 }
  0x6a   : > { %804 = vmatpush3.bf16.msra.mxu0 %v910_v30 }
  0x6b   : > { %805 = vmatprep.subr.bf16.mxu0 %v1029_v0 }
  0x6e   : > { %806 = vmatpush3.bf16.msra.mxu0 %v911_v31 }
  0x6f   : > { %807 = vmatprep.subr.bf16.mxu0 %v1029_v0 }
  0x72   : > { %808 = vmatpush3.bf16.msra.mxu0 %v912_v32 }
  0x73   : > { %809 = vmatprep.subr.bf16.mxu0 %v1029_v0 }
  0x76   : > { %810 = vmatpush3.bf16.msra.mxu0 %v913_v33 }
  0x79   : > { %812 = vmatmul.mubr.bf16.vlgmr.msra.gmra.mrb[4].mxu0 %v460_v36 }
 0x12c   : > { %v344_v37 = vpop.f32.mrb[0].mxu0  ;;  %v434_v38 = vpop.f32.mrb[0].mxu1 }
 0x12d   : > { %v773_v39 = vpop.f32.mrb[1].mxu0  ;;  %v435_v40 = vadd.f32 %v434_v38, %v344_v37  ;;  %v793_v41 = vpop.f32.mrb[1].mxu1 }
 0x12e   : > { %v347_v42 = vpop.f32.mrb[2].mxu0  ;;  %v437_v43 = vpop.f32.mrb[2].mxu1 }
 0x12f   : > { %v774_v44 = vpop.f32.mrb[3].mxu0  ;;  %v438_v45 = vadd.f32 %v437_v43, %v347_v42  ;;  %v794_v46 = vpop.f32.mrb[3].mxu1 }
 0x14c   : > { %v544_v47 = vpop.f32.mrb[4].mxu0 }
 0x14d   : > { %v551_v49 = vadd.f32 %v544_v47, %v435_v40  ;;  %v813_v50 = vpop.f32.mrb[5].mxu0 }
 0x14e   : > { %v547_v51 = vpop.f32.mrb[6].mxu0 }
 0x14f   : > { %v560_v52 = vadd.f32 %v712_v48, %v551_v49  ;;  %v552_v53 = vadd.f32 %v547_v51, %v438_v45  ;;  %v814_v54 = vpop.f32.mrb[7].mxu0 }
 0x151   : > { %v561_v55 = vadd.f32 %v712_v48, %v552_v53  ;;  %v562_v56 = vmax.f32 %v560_v52, 0.0 }
 0x153   : > { %v563_v57 = vmax.f32 %v561_v55, 0.0 }
 0x155   : > { %v726_v58 = vpack.c.bf16 %v563_v57, %v562_v56 }
 0x157   : > { %727 = vst [vmem:[%s192_s9] sm:$0xff] %v726_v58  }
 0x158   : > { %955 = shalt.err (!%p952_p6)
}
 0x159   : > { %s956_s28 = scalar_lea.hbm %s1190_s19, 128  ;;  %s960_s4 = scalar_lea.hbm %s1243_s3, 256 }
 0x15a   : > { %p957_p7 = scmp.ne.s32.totalorder %s1190_s19, %s956_s28  ;;  %p961_p0 = scmp.lt.u32.totalorder %s1190_s19, %s1243_s3 }
 0x15b   : > { %p962_p2 = scmp.lt.u32.totalorder %s960_s4, %s956_s28  ;;  %p964_p8 = scmp.lt.u32.totalorder %s956_s28, %s1190_s19 }
 0x15c   : > { %p958_p9 = pnand %p957_p7, %p1255_p10 }
 0x15d   : > { %p963_p4 = por %p962_p2, %p961_p0 }
 0x15e   : > { %p959_p12 = pneg %p958_p9 }
 0x15f   : > { %p965_p11 = por %p964_p8, %p963_p4 }
 0x161   : > { %p966_p13 = pnand %p965_p11, %p959_p12 }
 0x163   : > { %969 = shalt.err (!%p966_p13)
}
 0x164   : > { %s1032_s7 = smov 64   ;;  %s1033_s8 = smov 4  }
 0x165   : > { %820 = dma.vmem_to_hbm [thread:$0]  (%p1255_p10), %s1192_s10, 128, %s1190_s19, %s1194_s21, %s1032_s7, %s1032_s7, %s1033_s8  }
 0x166 PF: > { %p832_p1 = scmp.ge.s32.totalorder %s1024_s17, 2  ;;  %s605_s9 = sand.u32 1, %s1004_s12  }
 0x167   : > { %p1256_p3 = scmp.ne.s32.totalorder %s1249_s24, 0  ;;  %s606_s11 = scalar_lea.sflag [#allocation4], %s605_s9 }
 0x169   : > { %p827_p5 = pnand %p832_p1, %p1256_p3 }
 0x16b   : > { %999 = dma.done.wait (!%p827_p5), %s606_s11, 128  }
 0x16c   : > { %1001 = vsyncadd (!%p827_p5), %s606_s11, 4294967168  ;;  %s17_s17 = sadd.s32 1, %s1024_s17   ;;  %s1257_s12 = smov %s1008_s13 }
 0x16d   : > { %p14_p6 = scmp.ge.s32.totalorder %s17_s17, 4   ;;  %s1258_s13 = smov %s1012_s14 }
 0x16e   : > { %s1259_s14 = smov %s1107_s25  ;;  %s1260_s15 = smov %s1020_s16 }
 0x16f   : > { %s1261_s16 = smov %s1263_s20  ;;  %16 = sbr.rel (!%p14_p6) target bundleno = 5 (0x5), region = 73 }
 0x176   :  { %611 = vsyncpa [#allocation3], 1 }
 0x177   :  { %613 = vsyncpa [#allocation3 + $0x1], 1 }
 0x178   :  { %614 = vsyncpa [#allocation4], 1 }
 0x179   :  { %616 = vsyncpa [#allocation4 + $0x1], 1 }

</bundles_post_ra>
